<compile_context>
chip_gen: v7x
topology: tpu7x:2x2x1
jax: 0.10.0
libtpu: 0.0.40
codegen_flags: <defaults>
</compile_context>

<pallas_src>
import functools

import jax
import jax.numpy as jnp
from jax.experimental import pallas as pl
from jax.experimental.pallas import tpu as pltpu


def _round_up(x, m):
    return (x + m - 1) // m * m


def _vmem_capacity_bytes():
    """Physical VMEM per core (generation-aware), conservative fallback."""
    try:
        return int(pltpu.get_tpu_info().vmem_capacity_bytes)
    except Exception:
        # Assume the smallest current generation (v7x: 64 MiB per TC).
        return 64 * 1024 * 1024


def mlp_kernel(x_ref, w1_ref, b1_ref, w2_ref, b2_ref, o_ref, acc_ref,
               *, approximate_gelu):
    """One (row-tile, hidden-chunk) grid step of y = fc2(GELU(fc1(x)))."""
    h_idx = pl.program_id(1)

    @pl.when(h_idx == 0)
    def _init():
        acc_ref[...] = jnp.zeros_like(acc_ref)

    # fc1 partial for this hidden chunk.  x is cast to the MXU compute dtype
    # in-kernel (no host-side copy); accumulation is f32; bias added in f32.
    x = x_ref[...].astype(w1_ref.dtype)
    h = jnp.dot(x, w1_ref[...], preferred_element_type=jnp.float32)
    h = h + b1_ref[...]
    # tanh-GELU lowers to the EUP (own VLIW slot, ~free next to the MXU);
    # erf-GELU (torch nn.GELU default) is the opt-in bit-parity mode.
    h = jax.nn.gelu(h, approximate=approximate_gelu)

    # fc2 partial contribution of this hidden chunk, accumulated in f32.
    acc_ref[...] += jnp.dot(h.astype(w2_ref.dtype), w2_ref[...],
                            preferred_element_type=jnp.float32)

    @pl.when(h_idx == pl.num_programs(1) - 1)
    def _finalize():
        o_ref[...] = (acc_ref[...] + b2_ref[...]).astype(o_ref.dtype)
    # Dropout (p=0.0 / eval mode) is the identity -> intentionally omitted.


def mlp_pallas(x, w1, b1, w2, b2, *, tm=256, t_hid=None,
               compute_dtype=jnp.bfloat16, out_dtype=None,
               approximate_gelu=True):
    """FocalNet Mlp forward: x (B, N, C_in) -> (B, N, C_out).

    Weights are stored transposed w.r.t. nn.Linear: w1 (C_in, C_hid),
    w2 (C_hid, C_out); biases b1 (C_hid,), b2 (C_out,).
    """
    B, N, C_in = x.shape
    C_hid = w1.shape[1]
    C_out = w2.shape[1]
    if out_dtype is None:
        out_dtype = x.dtype

    csz = jnp.dtype(compute_dtype).itemsize
    xsz = jnp.dtype(x.dtype).itemsize
    osz = jnp.dtype(out_dtype).itemsize

    # --- row tiling -----------------------------------------------------------
    M = B * N
    tm = max(16, min(_round_up(tm, 16), _round_up(M, 16)))
    if M > 16 and _round_up(M, 16) <= tm:
        # Small-M case: split into two row tiles so both v7x TensorCores get
        # work (on 1-TC chips the extra grid step costs ~0.35 us, negligible).
        tm = max(16, _round_up((M + 1) // 2, 16))
    grid_m = pl.cdiv(M, tm)
    M_pad = grid_m * tm

    # --- lane-dense channel padding (exact: zero pads contribute zero) --------
    Cin_p = _round_up(C_in, 128)
    Cout_p = _round_up(C_out, 128)
    Chid_128 = _round_up(C_hid, 128)

    # --- hidden-chunk size so per-step residency fits the VMEM budget ---------
    vmem_cap = _vmem_capacity_bytes()
    budget = int(0.55 * vmem_cap)        # headroom for Mosaic internal scratch

    def est_bytes(th):
        return (2 * tm * Cin_p * xsz          # x tile           (double-buffered)
                + 2 * Cin_p * th * csz        # w1 chunk          (double-buffered)
                + 2 * th * 4                  # b1 chunk
                + 2 * th * Cout_p * csz       # w2 chunk          (double-buffered)
                + Cout_p * 4                  # b2
                + 2 * tm * Cout_p * osz       # out tile          (double-buffered)
                + tm * Cout_p * 4             # f32 accumulator scratch
                + 3 * tm * th * 4)            # f32 fc1/GELU temporaries

    if t_hid is None:
        t_hid = Chid_128
        while t_hid > 256 and est_bytes(t_hid) > budget:
            t_hid = max(256, _round_up(t_hid // 2, 128))
    t_hid = max(128, min(_round_up(t_hid, 128), Chid_128))
    Chid_p = _round_up(C_hid, t_hid)
    grid_h = Chid_p // t_hid

    # --- host-side prep (pads only when actually needed; x cast is in-kernel) -
    x2 = x.reshape(M, C_in)
    if M_pad != M or Cin_p != C_in:
        x2 = jnp.pad(x2, ((0, M_pad - M), (0, Cin_p - C_in)))
    w1p = w1.astype(compute_dtype)
    if w1p.shape != (Cin_p, Chid_p):
        w1p = jnp.pad(w1p, ((0, Cin_p - C_in), (0, Chid_p - C_hid)))
    w2p = w2.astype(compute_dtype)
    if w2p.shape != (Chid_p, Cout_p):
        w2p = jnp.pad(w2p, ((0, Chid_p - C_hid), (0, Cout_p - C_out)))
    # Biases stay f32: added after the f32-accumulated dot (no double rounding).
    b1p = b1.astype(jnp.float32)
    if Chid_p != C_hid:
        b1p = jnp.pad(b1p, (0, Chid_p - C_hid))
    b1p = b1p.reshape(1, Chid_p)
    b2p = b2.astype(jnp.float32)
    if Cout_p != C_out:
        b2p = jnp.pad(b2p, (0, Cout_p - C_out))
    b2p = b2p.reshape(1, Cout_p)

    # --- VMEM limit & cost hint -----------------------------------------------
    est = est_bytes(t_hid)
    vmem_limit = int(min(max(int(1.5 * est), 32 * 1024 * 1024),
                         int(0.85 * vmem_cap)))
    cost = pl.CostEstimate(
        flops=2 * M * (C_in * C_hid + C_hid * C_out),
        transcendentals=M * C_hid,
        bytes_accessed=(M * C_in * xsz
                        + (C_in * C_hid + C_hid * C_out) * csz
                        + (C_hid + C_out) * 4
                        + M * C_out * osz),
    )

    kernel = functools.partial(mlp_kernel, approximate_gelu=approximate_gelu)

    out = pl.pallas_call(
        kernel,
        out_shape=jax.ShapeDtypeStruct((M_pad, Cout_p), out_dtype),
        grid_spec=pltpu.PrefetchScalarGridSpec(
            num_scalar_prefetch=0,
            grid=(grid_m, grid_h),
            in_specs=[
                pl.BlockSpec((tm, Cin_p), lambda i, h: (i, 0)),
                pl.BlockSpec((Cin_p, t_hid), lambda i, h: (0, h)),
                pl.BlockSpec((1, t_hid), lambda i, h: (0, h)),
                pl.BlockSpec((t_hid, Cout_p), lambda i, h: (h, 0)),
                pl.BlockSpec((1, Cout_p), lambda i, h: (0, 0)),
            ],
            out_specs=pl.BlockSpec((tm, Cout_p), lambda i, h: (i, 0)),
            scratch_shapes=[pltpu.VMEM((tm, Cout_p), jnp.float32)],
        ),
        compiler_params=pltpu.CompilerParams(
            dimension_semantics=("parallel", "arbitrary"),
            vmem_limit_bytes=vmem_limit,
        ),
        cost_estimate=cost,
    )(x2, w1p, b1p, w2p, b2p)

    return out[:M, :C_out].reshape(B, N, C_out)


def mlp_reference(x, w1, b1, w2, b2):
    h = jnp.einsum("bnc,ch->bnh", x, w1) + b1
    h = jax.nn.gelu(h, approximate=False)
    return jnp.einsum("bnh,ho->bno", h, w2) + b2


if __name__ == "__main__":
    # Small shapes consistent with the module: tokens (B, N, C_in).
    B, N = 2, 8
    in_features, hidden_features, out_features = 32, 64, 32

    key = jax.random.PRNGKey(0)
    kx, k1, k2, k3, k4 = jax.random.split(key, 5)

    x = jax.random.normal(kx, (B, N, in_features), dtype=jnp.float32)
    # Deterministic parameter init (nn.Linear weights, stored transposed).
    w1 = jax.random.normal(k1, (in_features, hidden_features), jnp.float32) * 0.02
    b1 = jax.random.normal(k2, (hidden_features,), jnp.float32) * 0.01
    w2 = jax.random.normal(k3, (hidden_features, out_features), jnp.float32) * 0.02
    b2 = jax.random.normal(k4, (out_features,), jnp.float32) * 0.01

    y_ref = mlp_reference(x, w1, b1, w2, b2)

    # Default fast path: bf16 MXU matmuls (f32 accumulation) + tanh GELU.
    y = mlp_pallas(x, w1, b1, w2, b2)
    jax.block_until_ready(y)
    assert y.shape == (B, N, out_features)
    assert jnp.allclose(y, y_ref, atol=2e-2, rtol=2e-2)

    # Opt-in bit-parity path: f32 matmuls + exact (erf) GELU like nn.GELU().
    y_f32 = mlp_pallas(x, w1, b1, w2, b2, compute_dtype=jnp.float32,
                       approximate_gelu=False)
    jax.block_until_ready(y_f32)
    assert y_f32.shape == (B, N, out_features)
    assert jnp.allclose(y_f32, y_ref, atol=1e-5, rtol=1e-5)

    print("KERNEL_OK")
</pallas_src>

<mosaic_0001>
module attributes {stable_mosaic.version = 11 : i64} {
  func.func @mlp_kernel(%arg0: i32, %arg1: i32, %arg2: memref<16x128xf32, #tpu.memory_space<vmem>>, %arg3: memref<128x128xbf16, #tpu.memory_space<vmem>>, %arg4: memref<1x128xf32, #tpu.memory_space<vmem>>, %arg5: memref<128x128xbf16, #tpu.memory_space<vmem>>, %arg6: memref<1x128xf32, #tpu.memory_space<vmem>>, %arg7: memref<16x128xf32, #tpu.memory_space<vmem>>, %arg8: memref<16x128xf32, #tpu.memory_space<vmem>>) attributes {dimension_semantics = [#tpu.dimension_semantics<parallel>, #tpu.dimension_semantics<arbitrary>], iteration_bounds = array<i64: 1, 1>, scalar_prefetch = 0 : i64, scratch_operands = 1 : i64, tpu.core_type = #tpu.core_type<tc>, window_params = [{transform_indices = @transform_0, window_bounds = array<i64: 16, 128>}, {transform_indices = @transform_1, window_bounds = array<i64: 128, 128>}, {transform_indices = @transform_2, window_bounds = array<i64: 1, 128>}, {transform_indices = @transform_3, window_bounds = array<i64: 128, 128>}, {pipeline_mode = #tpu.pipeline_mode<synchronous>, transform_indices = @transform_4, window_bounds = array<i64: 1, 128>}, {transform_indices = @transform_5, window_bounds = array<i64: 16, 128>}]} {
    %c0_i32 = arith.constant 0 : i32
    %0 = arith.cmpi eq, %arg1, %c0_i32 : i32
    %1 = arith.extui %0 : i1 to i32
    %c0_i32_0 = arith.constant 0 : i32
    %2 = arith.cmpi ne, %1, %c0_i32_0 : i32
    scf.if %2 {
      %cst_19 = arith.constant 0.000000e+00 : f32
      %32 = vector.broadcast %cst_19 : f32 to vector<16x128xf32>
      %c0_20 = arith.constant 0 : index
      %c0_21 = arith.constant 0 : index
      %33 = vector.load %arg8[%c0_20, %c0_21] : memref<16x128xf32, #tpu.memory_space<vmem>>, vector<16x128xf32>
      tpu.vector_store %arg8[%c0_20, %c0_21], %32 {strides = array<i32>} : memref<16x128xf32, #tpu.memory_space<vmem>>, vector<16x128xf32>,
    } else {
    }
    %c0 = arith.constant 0 : index
    %c0_1 = arith.constant 0 : index
    %3 = vector.load %arg2[%c0, %c0_1] : memref<16x128xf32, #tpu.memory_space<vmem>>, vector<16x128xf32>
    %4 = arith.truncf %3 : vector<16x128xf32> to vector<16x128xbf16>
    %c0_2 = arith.constant 0 : index
    %c0_3 = arith.constant 0 : index
    %5 = vector.load %arg3[%c0_2, %c0_3] : memref<128x128xbf16, #tpu.memory_space<vmem>>, vector<128x128xbf16>
    %cst = arith.constant dense<0.000000e+00> : vector<16x128xf32>
    %6 = tpu.matmul %4, %5, %cst {dimension_numbers = #tpu.dot_dimension_numbers<[1], [0], [0], [1], [0, 0, 1, 1], [], []>} : vector<16x128xbf16>, vector<128x128xbf16>, vector<16x128xf32> -> vector<16x128xf32>
    %c0_4 = arith.constant 0 : index
    %c0_5 = arith.constant 0 : index
    %7 = vector.load %arg4[%c0_4, %c0_5] : memref<1x128xf32, #tpu.memory_space<vmem>>, vector<1x128xf32>
    %8 = vector.broadcast %7 : vector<1x128xf32> to vector<16x128xf32>
    %9 = arith.addf %6, %8 : vector<16x128xf32>
    %10 = arith.mulf %9, %9 : vector<16x128xf32>
    %11 = arith.mulf %9, %10 : vector<16x128xf32>
    %cst_6 = arith.constant 4.471500e-02 : f32
    %12 = vector.broadcast %cst_6 : f32 to vector<16x128xf32>
    %13 = arith.mulf %12, %11 : vector<16x128xf32>
    %14 = arith.addf %9, %13 : vector<16x128xf32>
    %cst_7 = arith.constant 0.797884583 : f32
    %15 = vector.broadcast %cst_7 : f32 to vector<16x128xf32>
    %16 = arith.mulf %15, %14 : vector<16x128xf32>
    %17 = math.tanh %16 : vector<16x128xf32>
    %cst_8 = arith.constant 1.000000e+00 : f32
    %18 = vector.broadcast %cst_8 : f32 to vector<16x128xf32>
    %19 = arith.addf %18, %17 : vector<16x128xf32>
    %cst_9 = arith.constant 5.000000e-01 : f32
    %20 = vector.broadcast %cst_9 : f32 to vector<16x128xf32>
    %21 = arith.mulf %20, %19 : vector<16x128xf32>
    %22 = arith.mulf %9, %21 : vector<16x128xf32>
    %c0_10 = arith.constant 0 : index
    %c0_11 = arith.constant 0 : index
    %23 = vector.load %arg8[%c0_10, %c0_11] : memref<16x128xf32, #tpu.memory_space<vmem>>, vector<16x128xf32>
    %24 = arith.truncf %22 : vector<16x128xf32> to vector<16x128xbf16>
    %c0_12 = arith.constant 0 : index
    %c0_13 = arith.constant 0 : index
    %25 = vector.load %arg5[%c0_12, %c0_13] : memref<128x128xbf16, #tpu.memory_space<vmem>>, vector<128x128xbf16>
    %cst_14 = arith.constant dense<0.000000e+00> : vector<16x128xf32>
    %26 = tpu.matmul %24, %25, %cst_14 {dimension_numbers = #tpu.dot_dimension_numbers<[1], [0], [0], [1], [0, 0, 1, 1], [], []>} : vector<16x128xbf16>, vector<128x128xbf16>, vector<16x128xf32> -> vector<16x128xf32>
    %27 = arith.addf %23, %26 : vector<16x128xf32>
    %c0_15 = arith.constant 0 : index
    %c0_16 = arith.constant 0 : index
    %28 = vector.load %arg8[%c0_15, %c0_16] : memref<16x128xf32, #tpu.memory_space<vmem>>, vector<16x128xf32>
    tpu.vector_store %arg8[%c0_15, %c0_16], %27 {strides = array<i32>} : memref<16x128xf32, #tpu.memory_space<vmem>>, vector<16x128xf32>,
    %c0_i32_17 = arith.constant 0 : i32
    %29 = arith.cmpi eq, %arg1, %c0_i32_17 : i32
    %30 = arith.extui %29 : i1 to i32
    %c0_i32_18 = arith.constant 0 : i32
    %31 = arith.cmpi ne, %30, %c0_i32_18 : i32
    scf.if %31 {
      %c0_19 = arith.constant 0 : index
      %c0_20 = arith.constant 0 : index
      %32 = vector.load %arg8[%c0_19, %c0_20] : memref<16x128xf32, #tpu.memory_space<vmem>>, vector<16x128xf32>
      %c0_21 = arith.constant 0 : index
      %c0_22 = arith.constant 0 : index
      %33 = vector.load %arg6[%c0_21, %c0_22] : memref<1x128xf32, #tpu.memory_space<vmem>>, vector<1x128xf32>
      %34 = vector.broadcast %33 : vector<1x128xf32> to vector<16x128xf32>
      %35 = arith.addf %32, %34 : vector<16x128xf32>
      %c0_23 = arith.constant 0 : index
      %c0_24 = arith.constant 0 : index
      %36 = vector.load %arg7[%c0_23, %c0_24] : memref<16x128xf32, #tpu.memory_space<vmem>>, vector<16x128xf32>
      tpu.vector_store %arg7[%c0_23, %c0_24], %35 {strides = array<i32>} : memref<16x128xf32, #tpu.memory_space<vmem>>, vector<16x128xf32>,
    } else {
    }
    return
  }
  func.func @transform_0(%arg0: i32, %arg1: i32) -> (i32, i32) {
    %c0_i32 = arith.constant 0 : i32
    %c0_i32_0 = arith.constant 0 : i32
    return %arg0, %c0_i32 : i32, i32
  }
  func.func @transform_1(%arg0: i32, %arg1: i32) -> (i32, i32) {
    %c0_i32 = arith.constant 0 : i32
    %c0_i32_0 = arith.constant 0 : i32
    return %c0_i32, %arg1 : i32, i32
  }
  func.func @transform_2(%arg0: i32, %arg1: i32) -> (i32, i32) {
    %c0_i32 = arith.constant 0 : i32
    %c0_i32_0 = arith.constant 0 : i32
    return %c0_i32, %arg1 : i32, i32
  }
  func.func @transform_3(%arg0: i32, %arg1: i32) -> (i32, i32) {
    %c0_i32 = arith.constant 0 : i32
    %c0_i32_0 = arith.constant 0 : i32
    return %arg1, %c0_i32 : i32, i32
  }
  func.func @transform_4(%arg0: i32, %arg1: i32) -> (i32, i32) {
    %c0_i32 = arith.constant 0 : i32
    %c0_i32_0 = arith.constant 0 : i32
    %c0_i32_1 = arith.constant 0 : i32
    return %c0_i32, %c0_i32_0 : i32, i32
  }
  func.func @transform_5(%arg0: i32, %arg1: i32) -> (i32, i32) {
    %c0_i32 = arith.constant 0 : i32
    %c0_i32_0 = arith.constant 0 : i32
    return %arg0, %c0_i32 : i32, i32
  }
}

</mosaic_0001>

<bundles_post_ra>
// kernel: tpu_custom_call.1
= control target key start
LH: loop header
LB: loop body
LE: loop exit
PB: predicated region body
PF: predicated region fallthrough
CT: control target
= control target key end

     0   :  { %10 = vsyncpa [#allocation4], 0  ;;  %s654_s0 = inlined_call_operand.hbm [shape: f32[16,128], index: 0, kind: input, shape index: {}]   ;;  %s655_s1 = inlined_call_operand.hbm [shape: bf16[128,128], index: 1, kind: input, shape index: {}]   ;;  %s656_s2 = inlined_call_operand.vmem [shape: f32[1,128], index: 2, kind: input, shape index: {}]   ;;  %s657_s3 = inlined_call_operand.hbm [shape: bf16[128,128], index: 3, kind: input, shape index: {}]   ;;  %s658_s4 = inlined_call_operand.vmem [shape: f32[1,128], index: 4, kind: input, shape index: {}]   ;;  %s659_s5 = inlined_call_operand.hbm [shape: f32[16,128], index: 5, kind: output, shape index: {}]  }
   0x1   :  { %11 = vsyncpa [#allocation7], 0 }
   0x2   :  { %12 = vsyncpa [#allocation5], 0  ;;  %s548_s18 = smov [#allocation6]   ;;  %s454_s22 = scalar_lea.hbm %s655_s1, 1024 }
   0x3   :  { %s30_s19 = sshll.u32 %s548_s18, 4  ;;  %p455_p0 = scmp.ne.s32.totalorder %s655_s1, %s454_s22  ;;  %s31_s19 = int_to_ptr.vmem [resolvable:$true] %s30_s19 }
   0x4   :  { %p458_p1 = scmp.lt.u32.totalorder %s454_s22, %s655_s1 }
   0x6   :  { %p460_p2 = pnand %p458_p1, %p455_p0 }
   0x8   :  { %463 = shalt.err (!%p460_p2)
}
   0x9   :  { %s464_s27 = scalar_lea.vmem %s31_s19, 1024  ;;  %p469_p4 = scmp.lt.s32.totalorder %s31_s19, %s31_s19 }
   0xa   :  { %p465_p3 = scmp.ne.s32.totalorder %s31_s19, %s464_s27  ;;  %p470_p5 = scmp.lt.s32.totalorder %s464_s27, %s464_s27 }
   0xc   :  { %p471_p6 = por %p470_p5, %p469_p4 }
   0xe   :  { %p472_p7 = pnand %p471_p6, %p465_p3 }
  0x10   :  { %475 = shalt.err (!%p472_p7)
}
  0x11   :  { %s549_s28 = smov 64   ;;  %s550_s29 = smov 4  }
  0x12   :  { %36 = dma.hbm_to_vmem [thread:$0]  %s655_s1, 1024, %s31_s19, [#allocation7], %s549_s28, %s549_s28, %s550_s29  }
  0x13   :  { %s551_s7 = smov [#allocation3]   ;;  %s476_s11 = scalar_lea.hbm %s654_s0, 256 }
  0x14   :  { %s18_s8 = sshll.u32 %s551_s7, 4  ;;  %p477_p8 = scmp.ne.s32.totalorder %s654_s0, %s476_s11  ;;  %s19_s8 = int_to_ptr.vmem [resolvable:$true] %s18_s8 }
  0x15   :  { %p480_p9 = scmp.lt.u32.totalorder %s476_s11, %s654_s0 }
  0x17   :  { %p482_p10 = pnand %p480_p9, %p477_p8 }
  0x19   :  { %485 = shalt.err (!%p482_p10)
}
  0x1a   :  { %s486_s16 = scalar_lea.vmem %s19_s8, 256  ;;  %p491_p12 = scmp.lt.s32.totalorder %s19_s8, %s19_s8 }
  0x1b   :  { %p487_p11 = scmp.ne.s32.totalorder %s19_s8, %s486_s16  ;;  %p492_p13 = scmp.lt.s32.totalorder %s486_s16, %s486_s16 }
  0x1d   :  { %p493_p0 = por %p492_p13, %p491_p12 }
  0x1f   :  { %p494_p1 = pnand %p493_p0, %p487_p11 }
  0x21   :  { %497 = shalt.err (!%p494_p1)
}
  0x22   :  { %s552_s1 = smov 128   ;;  %s553_s17 = smov 8  }
  0x23   :  { %24 = dma.hbm_to_vmem [thread:$0]  %s654_s0, 256, %s19_s8, [#allocation4], %s552_s1, %s552_s1, %s553_s17  }
  0x24   :  { %s554_s20 = smov [#allocation8]   ;;  %s498_s24 = scalar_lea.hbm %s657_s3, 1024 }
  0x25   :  { %s44_s21 = sshll.u32 %s554_s20, 4  ;;  %p499_p2 = scmp.ne.s32.totalorder %s657_s3, %s498_s24  ;;  %s45_s21 = int_to_ptr.vmem [resolvable:$true] %s44_s21 }
  0x26   :  { %p502_p3 = scmp.lt.u32.totalorder %s498_s24, %s657_s3 }
  0x28   :  { %p504_p4 = pnand %p502_p3, %p499_p2 }
  0x2a   :  { %507 = shalt.err (!%p504_p4)
}
  0x2b   :  { %s508_s6 = scalar_lea.vmem %s45_s21, 1024  ;;  %p513_p6 = scmp.lt.s32.totalorder %s45_s21, %s45_s21 }
  0x2c   :  { %p509_p5 = scmp.ne.s32.totalorder %s45_s21, %s508_s6  ;;  %p514_p7 = scmp.lt.s32.totalorder %s508_s6, %s508_s6 }
  0x2e   :  { %p515_p8 = por %p514_p7, %p513_p6 }
  0x30   :  { %p516_p9 = pnand %p515_p8, %p509_p5 }
  0x32   :  { %519 = shalt.err (!%p516_p9)
}
  0x33   :  { %50 = dma.hbm_to_vmem [thread:$0]  %s657_s3, 1024, %s45_s21, [#allocation7], %s549_s28, %s549_s28, %s550_s29  }
  0x34   :  { %542 = dma.done.wait [#allocation4], 256  }
  0x35   :  { %543 = vsyncadd [#allocation4], 4294967040 }
  0x36   :  { %544 = dma.done.wait [#allocation7], 2048  }
  0x37   :  { %545 = vsyncadd [#allocation7], 4294965248  ;;  %v555_v0 = vmov 0.0   ;;  %vm556_vm0 = vmmov 0   ;;  %v434_v1 = vld [vmem:[#allocation6] sm:$0xff]   ;;  %v435_v2 = vld [vmem:[#allocation6 + $0x8] sm:$0xff]  }
  0x38   :  { %384 = vmatprep.subr.bf16.mxu0 %v555_v0  ;;  %400 = vmatprep.mubr.msk.bf16.mxu0 %vm556_vm0, %v555_v0  ;;  %v436_v3 = vld [vmem:[#allocation6 + $0x10] sm:$0xff]   ;;  %v437_v4 = vld [vmem:[#allocation6 + $0x18] sm:$0xff]   ;;  %v438_v5 = vld [vmem:[#allocation6 + $0x20] sm:$0xff]   ;;  %s557_s8 = smov [#allocation9]  }
  0x39   :  { %404 = vmatprep.subr.bf16.mxu1 %v555_v0  ;;  %420 = vmatprep.mubr.msk.bf16.mxu1 %vm556_vm0, %v555_v0  ;;  %v439_v6 = vld [vmem:[#allocation6 + $0x28] sm:$0xff]   ;;  %v440_v7 = vld [vmem:[#allocation6 + $0x30] sm:$0xff]   ;;  %v441_v8 = vld [vmem:[#allocation6 + $0x38] sm:$0xff]   ;;  %s335_s9 = sshll.u32 %s557_s8, 4  ;;  %s336_s9 = int_to_ptr.vmem [resolvable:$true] %s335_s9 }
  0x3a   :  { %385 = vmatpush3.bf16.msra.mxu0 %v434_v1  ;;  %v69_v9 = vld [vmem:[#allocation3] sm:$0xff]  ;;  %v70_v10 = vld [vmem:[#allocation3 + $0x8] sm:$0xff]  ;;  %v442_v12 = vld [vmem:[#allocation8] sm:$0xff]   ;;  %s520_s10 = scalar_lea.vmem %s336_s9, 256  ;;  %p525_p11 = scmp.lt.s32.totalorder %s336_s9, %s336_s9 }
  0x3b   :  { %386 = vmatprep.subr.bf16.mxu0 %v555_v0  ;;  %v71_v11 = vpack.c.bf16 %v70_v10, %v69_v9  ;;  %405 = vmatpush3.bf16.msra.mxu1 %v442_v12  ;;  %v443_v13 = vld [vmem:[#allocation8 + $0x8] sm:$0xff]   ;;  %v444_v14 = vld [vmem:[#allocation8 + $0x10] sm:$0xff]   ;;  %v445_v15 = vld [vmem:[#allocation8 + $0x18] sm:$0xff]   ;;  %p521_p10 = scmp.ne.s32.totalorder %s336_s9, %s520_s10  ;;  %p526_p12 = scmp.lt.s32.totalorder %s520_s10, %s520_s10 }
  0x3c   :  { %406 = vmatprep.subr.bf16.mxu1 %v555_v0  ;;  %v446_v16 = vld [vmem:[#allocation8 + $0x20] sm:$0xff]   ;;  %v447_v17 = vld [vmem:[#allocation8 + $0x28] sm:$0xff]   ;;  %v448_v18 = vld [vmem:[#allocation8 + $0x30] sm:$0xff]  }
  0x3d   :  { %v449_v19 = vld [vmem:[#allocation8 + $0x38] sm:$0xff]   ;;  %v348_v20 = vld [vmem:[%s656_s2] ss:$0 sm:$0xff]  ;;  %p527_p13 = por %p526_p12, %p525_p11 }
  0x3e   :  { %387 = vmatpush3.bf16.msra.mxu0 %v435_v2  ;;  %v365_v46 = vld [vmem:[%s658_s4] ss:$0 sm:$0xff] }
  0x3f   :  { %388 = vmatprep.subr.bf16.mxu0 %v555_v0  ;;  %407 = vmatpush3.bf16.msra.mxu1 %v443_v13  ;;  %p528_p0 = pnand %p527_p13, %p521_p10 }
  0x40   :  { %408 = vmatprep.subr.bf16.mxu1 %v555_v0 }
  0x42   :  { %389 = vmatpush3.bf16.msra.mxu0 %v436_v3 }
  0x43   :  { %390 = vmatprep.subr.bf16.mxu0 %v555_v0  ;;  %409 = vmatpush3.bf16.msra.mxu1 %v444_v14 }
  0x44   :  { %410 = vmatprep.subr.bf16.mxu1 %v555_v0 }
  0x46   :  { %391 = vmatpush3.bf16.msra.mxu0 %v437_v4 }
  0x47   :  { %392 = vmatprep.subr.bf16.mxu0 %v555_v0  ;;  %411 = vmatpush3.bf16.msra.mxu1 %v445_v15 }
  0x48   :  { %412 = vmatprep.subr.bf16.mxu1 %v555_v0 }
  0x4a   :  { %393 = vmatpush3.bf16.msra.mxu0 %v438_v5 }
  0x4b   :  { %394 = vmatprep.subr.bf16.mxu0 %v555_v0  ;;  %413 = vmatpush3.bf16.msra.mxu1 %v446_v16 }
  0x4c   :  { %414 = vmatprep.subr.bf16.mxu1 %v555_v0 }
  0x4e   :  { %395 = vmatpush3.bf16.msra.mxu0 %v439_v6 }
  0x4f   :  { %396 = vmatprep.subr.bf16.mxu0 %v555_v0  ;;  %415 = vmatpush3.bf16.msra.mxu1 %v447_v17 }
  0x50   :  { %416 = vmatprep.subr.bf16.mxu1 %v555_v0 }
  0x52   :  { %397 = vmatpush3.bf16.msra.mxu0 %v440_v7 }
  0x53   :  { %398 = vmatprep.subr.bf16.mxu0 %v555_v0  ;;  %417 = vmatpush3.bf16.msra.mxu1 %v448_v18 }
  0x54   :  { %418 = vmatprep.subr.bf16.mxu1 %v555_v0 }
  0x56   :  { %399 = vmatpush3.bf16.msra.mxu0 %v441_v8 }
  0x57   :  { %419 = vmatpush3.bf16.msra.mxu1 %v449_v19 }
  0x59   :  { %401 = vmatmul.mubr.bf16.vlgmr.msra.gmra.mrb[0].mxu0 %v71_v11 }
 0x12c   :  { %v177_v21 = vpop.f32.mrb[0].mxu0 }
 0x12d   :  { %v178_v22 = vadd.f32 %v348_v20, %v177_v21  ;;  %v402_v23 = vpop.f32.mrb[1].mxu0 }
 0x12e   :  { %v180_v24 = vpop.f32.mrb[2].mxu0 }
 0x12f   :  { %v184_v25 = vmul.f32 %v178_v22, %v178_v22  ;;  %v181_v26 = vadd.f32 %v348_v20, %v180_v24  ;;  %v403_v27 = vpop.f32.mrb[3].mxu0 }
 0x131   :  { %v186_v28 = vmul.f32 %v184_v25, %v178_v22  ;;  %v185_v29 = vmul.f32 %v181_v26, %v181_v26 }
 0x133   :  { %v188_v30 = vmul.f32 0.044715, %v186_v28  ;;  %v187_v31 = vmul.f32 %v185_v29, %v181_v26 }
 0x135   :  { %v190_v32 = vadd.f32 %v188_v30, %v178_v22  ;;  %v189_v33 = vmul.f32 0.044715, %v187_v31 }
 0x137   :  { %v192_v34 = vmul.f32 0.7978846, %v190_v32  ;;  %v191_v35 = vadd.f32 %v189_v33, %v181_v26 }
 0x139   :  { %450 = vtanh.f32 %v192_v34  ;;  %v193_v36 = vmul.f32 0.7978846, %v191_v35 }
 0x13b   :  { %452 = vtanh.f32 %v193_v36 }
 0x143   :  { %v451_v37 = vpop.eup %450 }
 0x144   :  { %v196_v38 = vadd.f32 1.0, %v451_v37 }
 0x145   :  { %v453_v39 = vpop.eup %452 }
 0x146   :  { %v197_v40 = vadd.f32 1.0, %v453_v39  ;;  %v198_v41 = vmul.f32 0.5, %v196_v38 }
 0x148   :  { %v199_v42 = vmul.f32 0.5, %v197_v40  ;;  %v200_v43 = vmul.f32 %v198_v41, %v178_v22 }
 0x14a   :  { %v201_v44 = vmul.f32 %v199_v42, %v181_v26 }
 0x14c   :  { %v204_v45 = vpack.c.bf16 %v201_v44, %v200_v43 }
 0x14e   :  { %421 = vmatmul.mubr.bf16.vlgmr.msra.gmra.mrb[0].mxu1 %v204_v45 }
 0x221   :  { %v303_v47 = vpop.f32.mrb[0].mxu1 }
 0x222   :  { %v326_v48 = vadd.f32 %v365_v46, %v303_v47  ;;  %v422_v49 = vpop.f32.mrb[1].mxu1 }
 0x223   :  { %v306_v50 = vpop.f32.mrb[2].mxu1 }
 0x224   :  { %328 = vst [vmem:[#allocation9] sm:$0xff] %v326_v48  ;;  %v327_v51 = vadd.f32 %v365_v46, %v306_v50  ;;  %v423_v52 = vpop.f32.mrb[3].mxu1 }
 0x226   :  { %329 = vst [vmem:[#allocation9 + $0x8] sm:$0xff] %v327_v51 }
 0x227   :  { %531 = shalt.err (!%p528_p0)
}
 0x228   :  { %s532_s12 = scalar_lea.hbm %s659_s5, 256 }
 0x229   :  { %p533_p1 = scmp.ne.s32.totalorder %s659_s5, %s532_s12  ;;  %p536_p2 = scmp.lt.u32.totalorder %s532_s12, %s659_s5 }
 0x22b   :  { %p538_p3 = pnand %p536_p2, %p533_p1 }
 0x22d   :  { %541 = shalt.err (!%p538_p3)
}
 0x22e   :  { %341 = dma.vmem_to_hbm [thread:$0]  %s336_s9, 256, %s659_s5, [#allocation5], %s552_s1, %s552_s1, %s553_s17  }
 0x22f   :  { %546 = dma.done.wait [#allocation5], 256  }
 0x230   :  { %547 = vsyncadd [#allocation5], 4294967040 }
 0x231   :  { %345 = vsyncpa [#allocation4], 1 }
 0x232   :  { %346 = vsyncpa [#allocation7], 1 }
 0x233   :  { %347 = vsyncpa [#allocation5], 1 }

</bundles_post_ra>
